<compile_context>
chip_gen: v7x
topology: tpu7x:2x2x1
jax: 0.10.0
libtpu: 0.0.40
codegen_flags: <defaults>
</compile_context>

<pallas_src>
import functools

import jax
import jax.numpy as jnp
from jax import lax
from jax.experimental import pallas as pl
from jax.experimental.pallas import tpu as pltpu


def _ce_loss_kernel(x_ref, w_ref, b_ref, y_ref, out_ref,
                    m_sc, l_sc, p_sc, *, inv_batch):
    # Grid: (j = class tile [outer, weight-resident], i = batch tile [inner]).
    j = pl.program_id(0)
    i = pl.program_id(1)
    nj = pl.num_programs(0)

    bm = x_ref.shape[0]

    # Full-contraction logits tile (bm, bn) on the MXU.  W is in PyTorch (out,in)
    # layout; contraction over the last dim of both operands; bf16 in, f32 out.
    logits = lax.dot_general(
        x_ref[...], w_ref[...],
        dimension_numbers=(((1,), (1,)), ((), ())),
        preferred_element_type=jnp.float32) + b_ref[...]          # (bm, bn) f32

    bn = logits.shape[1]

    # Target-logit gather via lane-iota compare.  The iota depends only on the block
    # shape; the class-tile offset is folded into the labels instead.
    cls = lax.broadcasted_iota(jnp.int32, logits.shape, 1)
    y_local = y_ref[...] - j * bn                                  # (bm, 1) int32
    # NOTE: out-of-range labels silently contribute picked = 0 (matches torch UB).
    picked = jnp.sum(jnp.where(cls == y_local, logits, 0.0),
                     axis=-1, keepdims=True)
    tile_max = jnp.max(logits, axis=-1, keepdims=True)

    # Fresh per-row online-softmax state for this batch tile at the first class tile.
    @pl.when(j == 0)
    def _():
        m_sc[i] = jnp.full((bm, 1), -jnp.inf, dtype=jnp.float32)
        l_sc[i] = jnp.zeros((bm, 1), dtype=jnp.float32)
        p_sc[i] = jnp.zeros((bm, 1), dtype=jnp.float32)

    # Fold this class tile into the running logsumexp / target-logit state.
    p_sc[i] = p_sc[i] + picked
    m_prev = m_sc[i]
    m_new = jnp.maximum(m_prev, tile_max)
    l_sc[i] = (l_sc[i] * jnp.exp(m_prev - m_new)
               + jnp.sum(jnp.exp(logits - m_new), axis=-1, keepdims=True))
    m_sc[i] = m_new

    # Last class tile of the sweep: emit this batch tile's share of the mean loss.
    @pl.when(j == nj - 1)
    def _():
        lse = m_sc[i] + jnp.log(l_sc[i])                           # (bm, 1)
        out_ref[i] = jnp.sum(lse - p_sc[i]) * inv_batch


def _round_up(x, m):
    return (x + m - 1) // m * m


def _pick_tile(dim, preferred, sub):
    """Largest tile <= preferred that divides `dim` and is a multiple of `sub`;
    falls back to the full dim (always a legal Pallas block)."""
    if dim <= preferred:
        return dim
    t = (preferred // sub) * sub
    while t >= sub:
        if dim % t == 0:
            return t
        t -= sub
    return dim


def simple_model_loss(x, weight, bias, y, *, compute_dtype=jnp.bfloat16,
                      bm=None, bn=None, vmem_limit_bytes=None,
                      vmem_budget_bytes=40 << 20):
    """Forward of SimpleModel (nlayers=1): mean CE(x @ W^T + b, y).

    x: (B, H); weight: (H, H) in PyTorch (out_features, in_features) layout;
    bias: (H,); y: (B,) int class ids.  Matmul operands are cast to `compute_dtype`
    (default bf16); accumulation and the softmax / loss epilogue are f32.
    Returns a f32 scalar loss.
    """
    B, H = x.shape
    assert weight.shape == (H, H) and bias.shape == (H,) and y.shape == (B,)

    x_c = x.astype(compute_dtype)
    w_c = weight.astype(compute_dtype)
    itemsize = jnp.dtype(compute_dtype).itemsize

    auto_bm = bm is None
    auto_bn = bn is None
    bm = bm if bm is not None else _pick_tile(B, 256, 8)     # W-reuse factor
    bn = bn if bn is not None else _pick_tile(H, 1024, 128)  # class tile
    assert B % bm == 0 and H % bn == 0

    def footprint(bm_, bn_):
        nb_ = B // bm_
        buf = 2 * (bm_ * H + bn_ * H) * itemsize           # double-buffered x + W tiles
        buf += 2 * max(bn_, 128) * 4                        # bias tile (f32)
        buf += 2 * _round_up(bm_, 8) * 128 * 4              # label tile (lane-padded)
        buf += 3 * nb_ * _round_up(bm_, 8) * 128 * 4        # persistent m/l/p state
        buf += 2 * _round_up(bm_, 8) * max(bn_, 128) * 4    # f32 logits temporaries
        return buf

    # Shrink auto-picked tiles to a budget that fits every generation (v7x: 64 MiB).
    if auto_bn:
        while footprint(bm, bn) > vmem_budget_bytes and bn > 128:
            new_bn = _pick_tile(H, bn // 2, 128)
            if new_bn >= bn:
                break
            bn = new_bn
    if auto_bm:
        while footprint(bm, bn) > vmem_budget_bytes and bm > 8:
            new_bm = _pick_tile(B, bm // 2, 8)
            if new_bm >= bm:
                break
            bm = new_bm

    nb, nn = B // bm, H // bn

    if vmem_limit_bytes is None:
        vmem_limit_bytes = int(min(max(2 * footprint(bm, bn), 16 << 20), 64 << 20))

    b2 = bias.astype(jnp.float32).reshape(1, H)
    y2 = y.astype(jnp.int32).reshape(B, 1)

    kernel = functools.partial(_ce_loss_kernel, inv_batch=1.0 / B)

    cost = pl.CostEstimate(
        flops=2 * B * H * H,
        transcendentals=B * H,
        bytes_accessed=(B * H * itemsize * nn      # x re-read once per class-tile sweep
                        + H * H * itemsize         # W fetched from HBM exactly once
                        + H * 4 + B * 4 + nb * 4))

    grid_spec = pltpu.PrefetchScalarGridSpec(
        num_scalar_prefetch=0,
        grid=(nn, nb),                                     # j outer (weight-resident), i inner
        in_specs=[
            pl.BlockSpec((bm, H), lambda j, i: (i, 0)),    # x row tile, full contraction
            pl.BlockSpec((bn, H), lambda j, i: (j, 0)),    # W tile (out,in); constant over i
            pl.BlockSpec((1, bn), lambda j, i: (0, j)),    # bias tile; constant over i
            pl.BlockSpec((bm, 1), lambda j, i: (i, 0)),    # labels
        ],
        out_specs=pl.BlockSpec(memory_space=pltpu.SMEM),   # 1-D (nb,) scalar partials
        scratch_shapes=[
            pltpu.VMEM((nb, bm, 1), jnp.float32),          # running max (persistent)
            pltpu.VMEM((nb, bm, 1), jnp.float32),          # running sum of exp
            pltpu.VMEM((nb, bm, 1), jnp.float32),          # gathered target logits
        ],
    )

    # All axes "arbitrary": the shared SMEM output and the persistent VMEM state are
    # accumulated sequentially across the grid and must stay on one TensorCore.
    compiler_params = pltpu.CompilerParams(
        dimension_semantics=("arbitrary", "arbitrary"),
        vmem_limit_bytes=vmem_limit_bytes)

    partials = pl.pallas_call(
        kernel,
        grid_spec=grid_spec,
        out_shape=jax.ShapeDtypeStruct((nb,), jnp.float32),
        compiler_params=compiler_params,
        cost_estimate=cost,
    )(x_c, w_c, b2, y2)

    # Each partial is already divided by B; summing nb scalars on host is trivial.
    return jnp.sum(partials)


def _reference_loss(x, weight, bias, y):
    logits = x @ weight.T + bias
    lse = jax.scipy.special.logsumexp(logits, axis=-1)
    picked = jnp.take_along_axis(logits, y[:, None], axis=-1)[:, 0]
    return jnp.mean(lse - picked)


if __name__ == "__main__":
    def make_inputs(key, B, H):
        k_x, k_w, k_b, k_y = jax.random.split(key, 4)
        bound = 1.0 / jnp.sqrt(jnp.float32(H))
        x = jax.random.normal(k_x, (B, H), dtype=jnp.float32)
        w = jax.random.uniform(k_w, (H, H), minval=-bound, maxval=bound,
                               dtype=jnp.float32)
        b = jax.random.uniform(k_b, (H,), minval=-bound, maxval=bound,
                               dtype=jnp.float32)
        y = jax.random.randint(k_y, (B,), 0, H, dtype=jnp.int32)
        return x, w, b, y

    # SimpleModel toy size: batch=8, hidden_dim=32 (single-tile grid).
    x, w, b, y = make_inputs(jax.random.PRNGKey(0), 8, 32)
    ref = jax.block_until_ready(_reference_loss(x, w, b, y))

    # f32 path: tight check of the fused matmul + logsumexp + gather math.
    loss_f32 = jax.block_until_ready(
        simple_model_loss(x, w, b, y, compute_dtype=jnp.float32))
    assert jnp.allclose(loss_f32, ref, atol=1e-4, rtol=1e-4), (loss_f32, ref)

    # Default bf16 MXU path (f32 accumulation): looser tolerance.
    loss_bf16 = jax.block_until_ready(simple_model_loss(x, w, b, y))
    assert jnp.allclose(loss_bf16, ref, atol=3e-2, rtol=3e-2), (loss_bf16, ref)

    # Larger shape with explicit small tiles to exercise the full weight-resident
    # grid (2 class tiles outer x 2 batch tiles inner) and the persistent
    # online-logsumexp state across j sweeps.
    x2, w2, b2, y2 = make_inputs(jax.random.PRNGKey(1), 16, 256)
    loss2 = jax.block_until_ready(
        simple_model_loss(x2, w2, b2, y2, bm=8, bn=128))
    ref2 = jax.block_until_ready(_reference_loss(x2, w2, b2, y2))
    assert jnp.allclose(loss2, ref2, atol=3e-2, rtol=3e-2), (loss2, ref2)

    print("KERNEL_OK")
</pallas_src>

<mosaic_0001>
module attributes {stable_mosaic.version = 11 : i64} {
  func.func @_ce_loss_kernel(%arg0: i32, %arg1: i32, %arg2: memref<8x32xf32, #tpu.memory_space<vmem>>, %arg3: memref<32x32xf32, #tpu.memory_space<vmem>>, %arg4: memref<1x32xf32, #tpu.memory_space<vmem>>, %arg5: memref<8x1xi32, #tpu.memory_space<vmem>>, %arg6: memref<1xf32, #tpu.memory_space<smem>>, %arg7: memref<1x8x1xf32, #tpu.memory_space<vmem>>, %arg8: memref<1x8x1xf32, #tpu.memory_space<vmem>>, %arg9: memref<1x8x1xf32, #tpu.memory_space<vmem>>) attributes {dimension_semantics = [#tpu.dimension_semantics<arbitrary>, #tpu.dimension_semantics<arbitrary>], iteration_bounds = array<i64: 1, 1>, scalar_prefetch = 0 : i64, scratch_operands = 3 : i64, tpu.core_type = #tpu.core_type<tc>, window_params = [{transform_indices = @transform_0, window_bounds = array<i64: 8, 32>}, {transform_indices = @transform_1, window_bounds = array<i64: 32, 32>}, {transform_indices = @transform_2, window_bounds = array<i64: 1, 32>}, {transform_indices = @transform_3, window_bounds = array<i64: 8, 1>}, {transform_indices = @transform_4, window_bounds = array<i64: 1>}]} {
    %c0 = arith.constant 0 : index
    %c0_0 = arith.constant 0 : index
    %0 = vector.load %arg2[%c0, %c0_0] : memref<8x32xf32, #tpu.memory_space<vmem>>, vector<8x32xf32>
    %c0_1 = arith.constant 0 : index
    %c0_2 = arith.constant 0 : index
    %1 = vector.load %arg3[%c0_1, %c0_2] : memref<32x32xf32, #tpu.memory_space<vmem>>, vector<32x32xf32>
    %cst = arith.constant dense<0.000000e+00> : vector<8x32xf32>
    %2 = tpu.matmul %0, %1, %cst {dimension_numbers = #tpu.dot_dimension_numbers<[1], [1], [0], [0], [0, 0, 1, 0], [], []>} : vector<8x32xf32>, vector<32x32xf32>, vector<8x32xf32> -> vector<8x32xf32>
    %c0_3 = arith.constant 0 : index
    %c0_4 = arith.constant 0 : index
    %3 = vector.load %arg4[%c0_3, %c0_4] : memref<1x32xf32, #tpu.memory_space<vmem>>, vector<1x32xf32>
    %4 = vector.broadcast %3 : vector<1x32xf32> to vector<8x32xf32>
    %5 = arith.addf %2, %4 : vector<8x32xf32>
    %6 = tpu.iota {dimensions = array<i32: 1>} : vector<8x32xi32>
    %c0_5 = arith.constant 0 : index
    %c0_6 = arith.constant 0 : index
    %7 = vector.load %arg5[%c0_5, %c0_6] : memref<8x1xi32, #tpu.memory_space<vmem>>, vector<8x1xi32>
    %c32_i32 = arith.constant 32 : i32
    %8 = arith.muli %arg0, %c32_i32 : i32
    %9 = vector.broadcast %8 : i32 to vector<8x1xi32>
    %10 = arith.subi %7, %9 : vector<8x1xi32>
    %11 = vector.broadcast %10 : vector<8x1xi32> to vector<8x32xi32>
    %12 = arith.cmpi eq, %6, %11 : vector<8x32xi32>
    %cst_7 = arith.constant 0.000000e+00 : f32
    %13 = vector.broadcast %cst_7 : f32 to vector<8x32xf32>
    %14 = arith.select %12, %5, %13 : vector<8x32xi1>, vector<8x32xf32>
    %cst_8 = arith.constant dense<0.000000e+00> : vector<8xf32>
    %15 = vector.multi_reduction <add>, %14, %cst_8 [1] : vector<8x32xf32> to vector<8xf32>
    %16 = vector.shape_cast %15 : vector<8xf32> to vector<8x1xf32>
    %cst_9 = arith.constant dense<0xFF800000> : vector<8xf32>
    %17 = vector.multi_reduction <maximumf>, %5, %cst_9 [1] : vector<8x32xf32> to vector<8xf32>
    %18 = vector.shape_cast %17 : vector<8xf32> to vector<8x1xf32>
    %c0_i32 = arith.constant 0 : i32
    %19 = arith.cmpi eq, %arg0, %c0_i32 : i32
    %20 = arith.extui %19 : i1 to i32
    %c0_i32_10 = arith.constant 0 : i32
    %21 = arith.cmpi ne, %20, %c0_i32_10 : i32
    scf.if %21 {
      %cst_26 = arith.constant 0xFF800000 : f32
      %57 = vector.broadcast %cst_26 : f32 to vector<8x1xf32>
      %58 = arith.index_cast %arg1 : i32 to index
      %c0_27 = arith.constant 0 : index
      %c0_28 = arith.constant 0 : index
      %59 = vector.load %arg7[%58, %c0_27, %c0_28] : memref<1x8x1xf32, #tpu.memory_space<vmem>>, vector<1x8x1xf32>
      %60 = vector.shape_cast %59 : vector<1x8x1xf32> to vector<8x1xf32>
      %61 = vector.shape_cast %57 : vector<8x1xf32> to vector<1x8x1xf32>
      tpu.vector_store %arg7[%58, %c0_27, %c0_28], %61 {strides = array<i32>} : memref<1x8x1xf32, #tpu.memory_space<vmem>>, vector<1x8x1xf32>,
      %cst_29 = arith.constant 0.000000e+00 : f32
      %62 = vector.broadcast %cst_29 : f32 to vector<8x1xf32>
      %63 = arith.index_cast %arg1 : i32 to index
      %c0_30 = arith.constant 0 : index
      %c0_31 = arith.constant 0 : index
      %64 = vector.load %arg8[%63, %c0_30, %c0_31] : memref<1x8x1xf32, #tpu.memory_space<vmem>>, vector<1x8x1xf32>
      %65 = vector.shape_cast %64 : vector<1x8x1xf32> to vector<8x1xf32>
      %66 = vector.shape_cast %62 : vector<8x1xf32> to vector<1x8x1xf32>
      tpu.vector_store %arg8[%63, %c0_30, %c0_31], %66 {strides = array<i32>} : memref<1x8x1xf32, #tpu.memory_space<vmem>>, vector<1x8x1xf32>,
      %cst_32 = arith.constant 0.000000e+00 : f32
      %67 = vector.broadcast %cst_32 : f32 to vector<8x1xf32>
      %68 = arith.index_cast %arg1 : i32 to index
      %c0_33 = arith.constant 0 : index
      %c0_34 = arith.constant 0 : index
      %69 = vector.load %arg9[%68, %c0_33, %c0_34] : memref<1x8x1xf32, #tpu.memory_space<vmem>>, vector<1x8x1xf32>
      %70 = vector.shape_cast %69 : vector<1x8x1xf32> to vector<8x1xf32>
      %71 = vector.shape_cast %67 : vector<8x1xf32> to vector<1x8x1xf32>
      tpu.vector_store %arg9[%68, %c0_33, %c0_34], %71 {strides = array<i32>} : memref<1x8x1xf32, #tpu.memory_space<vmem>>, vector<1x8x1xf32>,
    } else {
    }
    %22 = arith.index_cast %arg1 : i32 to index
    %c0_11 = arith.constant 0 : index
    %c0_12 = arith.constant 0 : index
    %23 = vector.load %arg9[%22, %c0_11, %c0_12] : memref<1x8x1xf32, #tpu.memory_space<vmem>>, vector<1x8x1xf32>
    %24 = vector.shape_cast %23 : vector<1x8x1xf32> to vector<8x1xf32>
    %25 = arith.addf %24, %16 : vector<8x1xf32>
    %26 = arith.index_cast %arg1 : i32 to index
    %c0_13 = arith.constant 0 : index
    %c0_14 = arith.constant 0 : index
    %27 = vector.load %arg9[%26, %c0_13, %c0_14] : memref<1x8x1xf32, #tpu.memory_space<vmem>>, vector<1x8x1xf32>
    %28 = vector.shape_cast %27 : vector<1x8x1xf32> to vector<8x1xf32>
    %29 = vector.shape_cast %25 : vector<8x1xf32> to vector<1x8x1xf32>
    tpu.vector_store %arg9[%26, %c0_13, %c0_14], %29 {strides = array<i32>} : memref<1x8x1xf32, #tpu.memory_space<vmem>>, vector<1x8x1xf32>,
    %30 = arith.index_cast %arg1 : i32 to index
    %c0_15 = arith.constant 0 : index
    %c0_16 = arith.constant 0 : index
    %31 = vector.load %arg7[%30, %c0_15, %c0_16] : memref<1x8x1xf32, #tpu.memory_space<vmem>>, vector<1x8x1xf32>
    %32 = vector.shape_cast %31 : vector<1x8x1xf32> to vector<8x1xf32>
    %33 = arith.maximumf %32, %18 : vector<8x1xf32>
    %34 = arith.index_cast %arg1 : i32 to index
    %c0_17 = arith.constant 0 : index
    %c0_18 = arith.constant 0 : index
    %35 = vector.load %arg8[%34, %c0_17, %c0_18] : memref<1x8x1xf32, #tpu.memory_space<vmem>>, vector<1x8x1xf32>
    %36 = vector.shape_cast %35 : vector<1x8x1xf32> to vector<8x1xf32>
    %37 = arith.subf %32, %33 : vector<8x1xf32>
    %38 = math.exp %37 : vector<8x1xf32>
    %39 = arith.mulf %36, %38 : vector<8x1xf32>
    %40 = vector.broadcast %33 : vector<8x1xf32> to vector<8x32xf32>
    %41 = arith.subf %5, %40 : vector<8x32xf32>
    %42 = math.exp %41 : vector<8x32xf32>
    %cst_19 = arith.constant dense<0.000000e+00> : vector<8xf32>
    %43 = vector.multi_reduction <add>, %42, %cst_19 [1] : vector<8x32xf32> to vector<8xf32>
    %44 = vector.shape_cast %43 : vector<8xf32> to vector<8x1xf32>
    %45 = arith.addf %39, %44 : vector<8x1xf32>
    %46 = arith.index_cast %arg1 : i32 to index
    %c0_20 = arith.constant 0 : index
    %c0_21 = arith.constant 0 : index
    %47 = vector.load %arg8[%46, %c0_20, %c0_21] : memref<1x8x1xf32, #tpu.memory_space<vmem>>, vector<1x8x1xf32>
    %48 = vector.shape_cast %47 : vector<1x8x1xf32> to vector<8x1xf32>
    %49 = vector.shape_cast %45 : vector<8x1xf32> to vector<1x8x1xf32>
    tpu.vector_store %arg8[%46, %c0_20, %c0_21], %49 {strides = array<i32>} : memref<1x8x1xf32, #tpu.memory_space<vmem>>, vector<1x8x1xf32>,
    %50 = arith.index_cast %arg1 : i32 to index
    %c0_22 = arith.constant 0 : index
    %c0_23 = arith.constant 0 : index
    %51 = vector.load %arg7[%50, %c0_22, %c0_23] : memref<1x8x1xf32, #tpu.memory_space<vmem>>, vector<1x8x1xf32>
    %52 = vector.shape_cast %51 : vector<1x8x1xf32> to vector<8x1xf32>
    %53 = vector.shape_cast %33 : vector<8x1xf32> to vector<1x8x1xf32>
    tpu.vector_store %arg7[%50, %c0_22, %c0_23], %53 {strides = array<i32>} : memref<1x8x1xf32, #tpu.memory_space<vmem>>, vector<1x8x1xf32>,
    %c0_i32_24 = arith.constant 0 : i32
    %54 = arith.cmpi eq, %arg0, %c0_i32_24 : i32
    %55 = arith.extui %54 : i1 to i32
    %c0_i32_25 = arith.constant 0 : i32
    %56 = arith.cmpi ne, %55, %c0_i32_25 : i32
    scf.if %56 {
      %57 = arith.index_cast %arg1 : i32 to index
      %c0_26 = arith.constant 0 : index
      %c0_27 = arith.constant 0 : index
      %58 = vector.load %arg7[%57, %c0_26, %c0_27] : memref<1x8x1xf32, #tpu.memory_space<vmem>>, vector<1x8x1xf32>
      %59 = vector.shape_cast %58 : vector<1x8x1xf32> to vector<8x1xf32>
      %60 = arith.index_cast %arg1 : i32 to index
      %c0_28 = arith.constant 0 : index
      %c0_29 = arith.constant 0 : index
      %61 = vector.load %arg8[%60, %c0_28, %c0_29] : memref<1x8x1xf32, #tpu.memory_space<vmem>>, vector<1x8x1xf32>
      %62 = vector.shape_cast %61 : vector<1x8x1xf32> to vector<8x1xf32>
      %63 = math.log %62 : vector<8x1xf32>
      %64 = arith.addf %59, %63 : vector<8x1xf32>
      %65 = arith.index_cast %arg1 : i32 to index
      %c0_30 = arith.constant 0 : index
      %c0_31 = arith.constant 0 : index
      %66 = vector.load %arg9[%65, %c0_30, %c0_31] : memref<1x8x1xf32, #tpu.memory_space<vmem>>, vector<1x8x1xf32>
      %67 = vector.shape_cast %66 : vector<1x8x1xf32> to vector<8x1xf32>
      %68 = arith.subf %64, %67 : vector<8x1xf32>
      %69 = vector.shape_cast %68 : vector<8x1xf32> to vector<1x8x1xf32>
      %cst_32 = arith.constant dense<0.000000e+00> : vector<1xf32>
      %70 = vector.multi_reduction <add>, %69, %cst_32 [1, 2] : vector<1x8x1xf32> to vector<1xf32>
      %71 = vector.shape_cast %70 : vector<1xf32> to vector<1x1x1xf32>
      %72 = vector.extract %71[0, 0, 0] : f32 from vector<1x1x1xf32>
      %cst_33 = arith.constant 1.250000e-01 : f32
      %73 = arith.mulf %72, %cst_33 : f32
      %74 = arith.index_cast %arg1 : i32 to index
      %75 = memref.load %arg6[%74] : memref<1xf32, #tpu.memory_space<smem>>
      memref.store %73, %arg6[%74] : memref<1xf32, #tpu.memory_space<smem>>
    } else {
    }
    return
  }
  func.func @transform_0(%arg0: i32, %arg1: i32) -> (i32, i32) {
    %c0_i32 = arith.constant 0 : i32
    %c0_i32_0 = arith.constant 0 : i32
    return %arg1, %c0_i32 : i32, i32
  }
  func.func @transform_1(%arg0: i32, %arg1: i32) -> (i32, i32) {
    %c0_i32 = arith.constant 0 : i32
    %c0_i32_0 = arith.constant 0 : i32
    return %arg0, %c0_i32 : i32, i32
  }
  func.func @transform_2(%arg0: i32, %arg1: i32) -> (i32, i32) {
    %c0_i32 = arith.constant 0 : i32
    %c0_i32_0 = arith.constant 0 : i32
    return %c0_i32, %arg0 : i32, i32
  }
  func.func @transform_3(%arg0: i32, %arg1: i32) -> (i32, i32) {
    %c0_i32 = arith.constant 0 : i32
    %c0_i32_0 = arith.constant 0 : i32
    return %arg1, %c0_i32 : i32, i32
  }
  func.func @transform_4(%arg0: i32, %arg1: i32) -> i32 {
    %c0_i32 = arith.constant 0 : i32
    %c0_i32_0 = arith.constant 0 : i32
    return %c0_i32 : i32
  }
}

</mosaic_0001>

<bundles_post_ra>
// kernel: tpu_custom_call.1
= control target key start
LH: loop header
LB: loop body
LE: loop exit
PB: predicated region body
PF: predicated region fallthrough
CT: control target
= control target key end

     0   :  { %9 = vsyncpa [#allocation6], 0  ;;  %s390_s0 = inlined_call_operand.vmem [shape: f32[8,32], index: 0, kind: input, shape index: {}]   ;;  %s391_s1 = inlined_call_operand.hbm [shape: f32[32,32], index: 1, kind: input, shape index: {}]   ;;  %s392_s2 = inlined_call_operand.vmem [shape: f32[1,32], index: 2, kind: input, shape index: {}]   ;;  %s393_s3 = inlined_call_operand.vmem [shape: s32[8,1], index: 3, kind: input, shape index: {}]   ;;  %s394_s4 = inlined_call_operand.hbm [shape: f32[1], index: 4, kind: output, shape index: {}]  }
   0x1   :  { %10 = vsyncpa [#allocation7], 0  ;;  %s310_s15 = smov [#allocation5]   ;;  %s274_s19 = scalar_lea.hbm %s391_s1, 512 }
   0x2   :  { %s18_s16 = sshll.u32 %s310_s15, 4  ;;  %p275_p0 = scmp.ne.s32.totalorder %s391_s1, %s274_s19  ;;  %s19_s16 = int_to_ptr.vmem [resolvable:$true] %s18_s16 }
   0x3   :  { %p278_p1 = scmp.lt.u32.totalorder %s274_s19, %s391_s1 }
   0x5   :  { %p280_p2 = pnand %p278_p1, %p275_p0 }
   0x7   :  { %283 = shalt.err (!%p280_p2)
}
   0x8   :  { %s284_s24 = scalar_lea.vmem %s19_s16, 512  ;;  %p289_p4 = scmp.lt.s32.totalorder %s19_s16, %s19_s16 }
   0x9   :  { %p285_p3 = scmp.ne.s32.totalorder %s19_s16, %s284_s24  ;;  %p290_p5 = scmp.lt.s32.totalorder %s284_s24, %s284_s24 }
   0xb   :  { %p291_p6 = por %p290_p5, %p289_p4 }
   0xd   :  { %p292_p7 = pnand %p291_p6, %p285_p3 }
   0xf   :  { %295 = shalt.err (!%p292_p7)
}
  0x10   :  { %s311_s25 = smov 128   ;;  %s312_s26 = smov 8  }
  0x11   :  { %24 = dma.hbm_to_vmem [thread:$0]  %s391_s1, 512, %s19_s16, [#allocation6], %s311_s25, %s311_s25, %s312_s26  }
  0x12   :  { %306 = dma.done.wait [#allocation6], 512  }
  0x13   :  { %307 = vsyncadd [#allocation6], 4294966784  ;;  %v313_v0 = vmov 0.0|0.0   ;;  %vm314_vm0 = vmmov 0   ;;  %v315_v1 = vmov 0.0   ;;  %vm153_vm1 = vcmask 7168  }
  0x14   :  { %247 = vmatprep.subr.bf16.mxu0 %v313_v0  ;;  %244 = vmatprep.mubr.msk.f32.mxu0 %vm314_vm0, %v315_v1  ;;  %156 = vst.msk [vmem:[#allocation3] sm:$0xff] %vm153_vm1, %v315_v1  ;;  %158 = vst.msk [vmem:[#allocation4] sm:$0xff] %vm153_vm1, %v315_v1  ;;  %v316_v2 = vmov 0   ;;  %vm44_vm2 = vcmask 261120   ;;  %v33_v3 = vld [vmem:[#allocation5] sm:$0xff]  ;;  %v34_v4 = vld [vmem:[#allocation5 + $0x8] sm:$0xff]  ;;  %v130_v24 = vlaneseq }
  0x15   :  { %267 = vset.pattern.permute.xlu1 %v316_v2  ;;  %266 = vset.pattern.permute.xlu0 %v316_v2  ;;  %vm249_vm3 = vmpackc.low %vm44_vm2, %vm44_vm2  ;;  %v248_v5 = vpack.c.bf16 %v34_v4, %v33_v3  ;;  %v132_v6 = vld [vmem:[%s393_s3] sm:$0xff]  ;;  %v35_v7 = vld [vmem:[#allocation5 + $0x10] sm:$0xff]  ;;  %v317_v11 = vmov -inf   ;;  %s296_s9 = scalar_lea.hbm %s394_s4, 16 }
  0x16   :  { %137 = vperm.xlu1 %267, %v132_v6   ;;  %v36_v8 = vld [vmem:[#allocation5 + $0x18] sm:$0xff]  ;;  %v32_v10 = vld [vmem:[%s390_s0] sm:$0xff]  ;;  %154 = vst.msk [vmem:[#allocation2] sm:$0xff] %vm153_vm1, %v317_v11  ;;  %v131_v25 = vand.u32 127, %v130_v24  ;;  %p297_p8 = scmp.ne.s32.totalorder %s394_s4, %s296_s9  ;;  %p300_p9 = scmp.lt.u32.totalorder %s296_s9, %s394_s4 }
  0x17   :  { %250 = vmatpush3.bf16.xpose.msk.msra.mxu0 %vm249_vm3, %v248_v5  ;;  %v252_v9 = vpack.c.bf16 %v36_v8, %v35_v7  ;;  %v225_v12 = vld [vmem:[%s392_s2] ss:$0 sm:$0xff] }
  0x18   :  { %251 = vmatprep.subr.bf16.mxu0 %v313_v0  ;;  %p302_p10 = pnand %p300_p9, %p297_p8 }
  0x1b   :  { %v169_v33 = vld [vmem:[#allocation3] sm:$0xff]  ;;  %v161_v37 = vld [vmem:[#allocation4] sm:$0xff] }
  0x1d   :  { %v166_v17 = vld [vmem:[#allocation2] sm:$0xff] }
  0x1f   :  { %254 = vmatpush3.bf16.xpose.msk.msra.mxu0 %vm249_vm3, %v252_v9 }
  0x26   :  { %245 = vmatmul.mubr.msk.f32.vlgmr.msra.gmra.mrb[0].mxu0 %vm44_vm2, %v32_v10 }
  0x95   :  { %v138_v26 = vpop.permute.xlu1 %137 }
  0x96   :  { %vm139_vm4 = vcmp.eq.s32.totalorder %v131_v25, %v138_v26 }
  0xf9   :  { %v126_v13 = vpop.f32.mrb[0].mxu0 }
  0xfa   :  { %v127_v14 = vadd.f32 %v225_v12, %v126_v13  ;;  %v246_v15 = vpop.f32.mrb[1].mxu0 }
  0xfc   :  { %v144_v16 = vsel %vm44_vm2, %v127_v14, -inf  ;;  %v140_v29 = vsel %vm139_vm4, %v127_v14, 0.0 }
  0xfd   :  { %145 = vmax.xlane.f32.xlu0 %v144_v16  ;;  %v141_v30 = vsel %vm44_vm2, %v140_v29, 0.0 }
 0x18a   :  { %v146_v18 = vpop.xlane.xlu0 %145 }
 0x18b   :  { %v167_v19 = vmax.f32 %v166_v17, %v146_v18 }
 0x18d   :  { %v170_v20 = vsub.f32 %v166_v17, %v167_v19  ;;  %187 = vst.msk [vmem:[#allocation2] sm:$0xff] %vm153_vm1, %v167_v19  ;;  %176 = vperm.xlu0 %266, %v167_v19  }
 0x18f   :  { %v171_v31 = vmul.f32 1.442695, %v170_v20 }
 0x194   :  { %v191_v43 = vld [vmem:[#allocation2] sm:$0xff] }
 0x20c   :  { %v177_v21 = vpop.permute.xlu0 %176 }
 0x20d   :  { %v179_v22 = vsub.f32 %v127_v14, %v177_v21 }
 0x20f   :  { %v180_v23 = vmul.f32 1.442695, %v179_v22 }
 0x211   :  { %268 = vpow2.f32 %v180_v23 }
 0x212   :  { %270 = vpow2.f32 %v171_v31 }
 0x21b   :  { %v269_v27 = vpop.eup %268 }
 0x21c   :  { %v182_v28 = vsel %vm44_vm2, %v269_v27, 0.0  ;;  %v271_v32 = vpop.eup %270 }
 0x21d   :  { %183 = vadd.xlane.f32.xlu1 %v182_v28  ;;  %v173_v34 = vmul.f32 %v271_v32, %v169_v33 }
 0x221   :  { %142 = vadd.xlane.f32.xlu1 %v141_v30 }
 0x2aa   :  { %v184_v35 = vpop.xlane.xlu1 %183 }
 0x2ab   :  { %v185_v36 = vadd.f32 %v184_v35, %v173_v34 }
 0x2ad   :  { %186 = vst.msk [vmem:[#allocation3] sm:$0xff] %vm153_vm1, %v185_v36 }
 0x2ae   :  { %v143_v38 = vpop.xlane.xlu1 %142 }
 0x2af   :  { %v162_v39 = vadd.f32 %v161_v37, %v143_v38 }
 0x2b1   :  { %164 = vst.msk [vmem:[#allocation4] sm:$0xff] %vm153_vm1, %v162_v39 }
 0x2b4   :  { %v192_v40 = vld [vmem:[#allocation3] sm:$0xff] }
 0x2b5   :  { %272 = vlog2.f32 %v192_v40 }
 0x2b8   :  { %v196_v45 = vld [vmem:[#allocation4] sm:$0xff] }
 0x2bf   :  { %v273_v41 = vpop.eup %272 }
 0x2c0   :  { %v194_v42 = vmul.f32 0.6931472, %v273_v41 }
 0x2c2   :  { %v195_v44 = vadd.f32 %v194_v42, %v191_v43 }
 0x2c4   :  { %v197_v46 = vsub.f32 %v195_v44, %v196_v45 }
 0x2c6   :  { %v198_v47 = vsel %vm153_vm1, %v197_v46, 0.0 }
 0x2c7   :  { %199 = vadd.xlane.f32.xlu1 %v198_v47 }
 0x354   :  { %v200_v48 = vpop.xlane.xlu1 %199 }
 0x355   :  { %v201_v49 = vrot.slane %v200_v48, 4 }
 0x357   :  { %v202_v50 = vadd.f32 %v201_v49, %v200_v48 }
 0x359   :  { %v203_v51 = vrot.slane %v202_v50, 2 }
 0x35b   :  { %v204_v52 = vadd.f32 %v203_v51, %v202_v50 }
 0x35d   :  { %v205_v53 = vrot.slane %v204_v52, 1 }
 0x35f   :  { %v206_v54 = vadd.f32 %v205_v53, %v204_v52 }
 0x361   :  { %255 = vpush %v206_v54 }
 0x392   :  { %s256_s0 = spop %255 }
 0x393   :  { %s208_s2 = smul.f32 0.125, %s256_s0 }
 0x395   :  { %210 = sst [smem:[#allocation8]] %s208_s2 }
 0x396   :  { %305 = shalt.err (!%p302_p10)
}
 0x397   :  { %s318_s14 = smov [#allocation8]  }
 0x398   :  { %218 = dma.smem_to_hbm %s318_s14, 16, %s394_s4, [#allocation7]  }
 0x399   :  { %308 = dma.done.wait [#allocation7], 16  }
 0x39a   :  { %309 = vsyncadd [#allocation7], 4294967280 }
 0x39b   :  { %222 = sfence }
 0x39c   :  { %223 = vsyncpa [#allocation6], 1 }
 0x39d   :  { %224 = vsyncpa [#allocation7], 1 }

</bundles_post_ra>
